<compile_context>
chip_gen: v7x
topology: tpu7x:2x2x1
jax: 0.10.0
libtpu: 0.0.40
codegen_flags: <defaults>
</compile_context>

<pallas_src>
import functools

import jax
import jax.numpy as jnp
from jax.experimental import pallas as pl
from jax.experimental.pallas import tpu as pltpu


def _combo_stats_kernel(logits_ref, tgt_ref, ce_ref, inter_ref, psum_ref, tsum_ref,
                        *, hw, tile, tiles_per_half, needs_mask):
    """Accumulate ComboLoss statistics for one pixel tile.

    logits_ref : (1, C, TILE) float  -- classes on sublanes, pixels on lanes
    tgt_ref    : (1, 1, TILE) int32
    ce_ref     : (1, 1, 1, 1) f32    -- running sum of per-pixel CE
    inter_ref  : (1, 1, C, 1) f32    -- running per-class intersection
    psum_ref   : (1, 1, C, 1) f32    -- running per-class prob sum
    tsum_ref   : (1, 1, C, 1) f32    -- running per-class target count
    """
    h = pl.program_id(1)
    j = pl.program_id(2)

    x = logits_ref[0].astype(jnp.float32)               # (C, TILE)
    t = tgt_ref[0]                                       # (1, TILE) int32
    c = x.shape[0]

    if needs_mask:
        lane = jax.lax.broadcasted_iota(jnp.int32, (1, tile), 1)
        pix0 = (h * tiles_per_half + j) * tile
        valid = (pix0 + lane) < hw                       # (1, TILE) bool
        t = jnp.where(valid, t, -1)                      # row-wide; never matches a class

    # Numerically-stable softmax pieces over the class (sublane) axis.
    m = jnp.max(x, axis=0, keepdims=True)                # (1, TILE)
    e = jnp.exp(x - m)                                   # (C, TILE)  (EUP)
    s = jnp.sum(e, axis=0, keepdims=True)                # (1, TILE)
    inv_s = pl.reciprocal(s, approx=True)                # EUP vrcp (otherwise-idle slot)
    inv_s = inv_s * (2.0 - s * inv_s)                    # one Newton step -> ~f32 exact
    probs = e * inv_s                                    # (C, TILE)

    # One-hot as a boolean mask; feed selects straight into the reductions
    # (no float one-hot materialization, no extra multiplies).
    cls = jax.lax.broadcasted_iota(jnp.int32, (c, tile), 0)
    eq = cls == t                                        # (C, TILE) bool

    # Cross-entropy: sum_pixels( m + log s - x[target] ) -- logp never built.
    ce_row = m + jnp.log(s)                              # (1, TILE)
    if needs_mask:
        ce_row = jnp.where(valid, ce_row, 0.0)           # row-wide mask only
    x_t_row = jnp.sum(jnp.where(eq, x, 0.0), axis=0, keepdims=True)        # (1, TILE)
    ce_tile = jnp.sum(ce_row - x_t_row, axis=1, keepdims=True)             # (1, 1)

    inter_pc = jnp.sum(jnp.where(eq, probs, 0.0), axis=1, keepdims=True)   # (C, 1)
    p_valid = jnp.where(valid, probs, 0.0) if needs_mask else probs
    psum_pc = jnp.sum(p_valid, axis=1, keepdims=True)                       # (C, 1)
    tsum_pc = jnp.sum(eq.astype(jnp.float32), axis=1, keepdims=True)        # (C, 1)

    @pl.when(j == 0)
    def _init():
        ce_ref[...] = jnp.zeros_like(ce_ref)
        inter_ref[...] = jnp.zeros_like(inter_ref)
        psum_ref[...] = jnp.zeros_like(psum_ref)
        tsum_ref[...] = jnp.zeros_like(tsum_ref)

    ce_ref[...] += ce_tile.reshape(1, 1, 1, 1)
    inter_ref[...] += inter_pc.reshape(1, 1, c, 1)
    psum_ref[...] += psum_pc.reshape(1, 1, c, 1)
    tsum_ref[...] += tsum_pc.reshape(1, 1, c, 1)


def _pick_tile(hw, c, target_bytes=2 * 1024 * 1024, min_tile=256):
    """Pick a pixel-tile (lane count) so one f32 (C, tile) block is ~target_bytes."""
    budget = (target_bytes // (4 * c)) // 128 * 128
    budget = max(min_tile, min(budget, 1 << 17))
    if hw <= budget:
        return hw                                    # full pixel axis, one block
    # Prefer a tile that divides hw so remainder masking never runs.
    t = budget
    lo = max(min_tile, budget // 2)
    while t >= lo:
        if hw % t == 0:
            return t
        t -= 128
    return budget


def combo_loss(logits_nchw, targets_nhw, *, dice_weight=0.5, ce_weight=0.5,
               dice_smooth=1e-6, target_block_bytes=2 * 1024 * 1024):
    """logits_nchw: [N, C, H, W] float; targets_nhw: [N, H, W] int."""
    n, c, h, w = logits_nchw.shape
    hw = h * w

    # Free reshapes only -- no extra HBM transpose pass.
    logits_flat = logits_nchw.reshape(n, c, hw)
    targets_flat = targets_nhw.reshape(n, 1, hw).astype(jnp.int32)

    tile = _pick_tile(hw, c, target_bytes=target_block_bytes)
    nt = -(-hw // tile)                              # blocks along the pixel axis
    n_halves = 2 if nt >= 2 else 1                   # keep both v7x TCs busy even at N=1
    tiles_per_half = -(-nt // n_halves)
    total_tiles = n_halves * tiles_per_half
    needs_mask = (total_tiles * tile) != hw
    clamp = total_tiles > nt                         # duplicated (fully masked) tail tile

    def pix_map(b, hh, j):
        idx = hh * tiles_per_half + j
        if clamp:
            idx = jnp.minimum(idx, nt - 1)
        return (b, 0, idx)

    kernel = functools.partial(_combo_stats_kernel, hw=hw, tile=tile,
                               tiles_per_half=tiles_per_half, needs_mask=needs_mask)

    p_total = n * hw
    cost = pl.CostEstimate(
        flops=10 * p_total * c,
        transcendentals=p_total * (c + 2),
        bytes_accessed=(p_total * c * logits_nchw.dtype.itemsize
                        + p_total * 4
                        + n * n_halves * (3 * c + 1) * 4),
    )

    out_shapes = (
        jax.ShapeDtypeStruct((n, n_halves, 1, 1), jnp.float32),   # ce sum
        jax.ShapeDtypeStruct((n, n_halves, c, 1), jnp.float32),   # intersection
        jax.ShapeDtypeStruct((n, n_halves, c, 1), jnp.float32),   # prob sum
        jax.ShapeDtypeStruct((n, n_halves, c, 1), jnp.float32),   # target count
    )

    ce_p, inter_p, psum_p, tsum_p = pl.pallas_call(
        kernel,
        out_shape=out_shapes,
        grid_spec=pltpu.PrefetchScalarGridSpec(
            num_scalar_prefetch=0,
            grid=(n, n_halves, tiles_per_half),
            in_specs=[
                pl.BlockSpec((1, c, tile), pix_map),
                pl.BlockSpec((1, 1, tile), pix_map),
            ],
            out_specs=[
                pl.BlockSpec((1, 1, 1, 1), lambda b, hh, j: (b, hh, 0, 0)),
                pl.BlockSpec((1, 1, c, 1), lambda b, hh, j: (b, hh, 0, 0)),
                pl.BlockSpec((1, 1, c, 1), lambda b, hh, j: (b, hh, 0, 0)),
                pl.BlockSpec((1, 1, c, 1), lambda b, hh, j: (b, hh, 0, 0)),
            ],
        ),
        compiler_params=pltpu.CompilerParams(
            dimension_semantics=("parallel", "parallel", "arbitrary"),
            vmem_limit_bytes=48 * 1024 * 1024),
        cost_estimate=cost,
    )(logits_flat, targets_flat)

    # Tiny finalize in plain JAX.
    ce_loss = jnp.sum(ce_p) / jnp.float32(p_total)
    inter = jnp.sum(inter_p, axis=(0, 1, 3))                       # (C,)
    union = jnp.sum(psum_p, axis=(0, 1, 3)) + jnp.sum(tsum_p, axis=(0, 1, 3))
    dice = (2.0 * inter + dice_smooth) / (union + dice_smooth)
    dice_loss = jnp.mean(1.0 - dice)
    return ce_weight * ce_loss + dice_weight * dice_loss


def _reference_combo_loss(logits, targets, dice_weight=0.5, ce_weight=0.5, smooth=1e-6):
    # Pure-JAX reference matching the PyTorch module semantics (weight=None).
    n, c, h, w = logits.shape
    logp = jax.nn.log_softmax(logits, axis=1)
    onehot = jax.nn.one_hot(targets, c, dtype=jnp.float32).transpose(0, 3, 1, 2)
    ce = -jnp.sum(logp * onehot) / (n * h * w)
    probs = jax.nn.softmax(logits, axis=1)
    dims = (0, 2, 3)
    inter = jnp.sum(probs * onehot, axis=dims)
    union = jnp.sum(probs, axis=dims) + jnp.sum(onehot, axis=dims)
    dice = (2.0 * inter + smooth) / (union + smooth)
    dice_loss = jnp.mean(1.0 - dice)
    return ce_weight * ce + dice_weight * dice_loss


if __name__ == "__main__":
    key = jax.random.PRNGKey(0)
    k1, k2 = jax.random.split(key)
    N, C, H, W = 2, 4, 16, 16
    logits = jax.random.normal(k1, (N, C, H, W), dtype=jnp.float32)
    targets = jax.random.randint(k2, (N, H, W), 0, C, dtype=jnp.int32)

    loss = combo_loss(logits, targets)
    jax.block_until_ready(loss)

    ref = _reference_combo_loss(logits, targets)
    assert jnp.allclose(loss, ref, atol=1e-5, rtol=1e-5), (loss, ref)
    print("KERNEL_OK")
</pallas_src>

<mosaic_0001>
module attributes {stable_mosaic.version = 11 : i64} {
  func.func @_combo_stats_kernel(%arg0: i32, %arg1: i32, %arg2: i32, %arg3: memref<1x4x256xf32, #tpu.memory_space<vmem>>, %arg4: memref<1x1x256xi32, #tpu.memory_space<vmem>>, %arg5: memref<1x1x1x1xf32, #tpu.memory_space<vmem>>, %arg6: memref<1x1x4x1xf32, #tpu.memory_space<vmem>>, %arg7: memref<1x1x4x1xf32, #tpu.memory_space<vmem>>, %arg8: memref<1x1x4x1xf32, #tpu.memory_space<vmem>>) attributes {dimension_semantics = [#tpu.dimension_semantics<parallel>, #tpu.dimension_semantics<parallel>, #tpu.dimension_semantics<arbitrary>], iteration_bounds = array<i64: 2, 1, 1>, scalar_prefetch = 0 : i64, scratch_operands = 0 : i64, tpu.core_type = #tpu.core_type<tc>, window_params = [{transform_indices = @transform_0, window_bounds = array<i64: 1, 4, 256>}, {transform_indices = @transform_1, window_bounds = array<i64: 1, 1, 256>}, {transform_indices = @transform_2, window_bounds = array<i64: 1, 1, 1, 1>}, {transform_indices = @transform_3, window_bounds = array<i64: 1, 1, 4, 1>}, {transform_indices = @transform_4, window_bounds = array<i64: 1, 1, 4, 1>}, {transform_indices = @transform_5, window_bounds = array<i64: 1, 1, 4, 1>}]} {
    %c0 = arith.constant 0 : index
    %c0_0 = arith.constant 0 : index
    %c0_1 = arith.constant 0 : index
    %0 = vector.load %arg3[%c0, %c0_0, %c0_1] : memref<1x4x256xf32, #tpu.memory_space<vmem>>, vector<1x4x256xf32>
    %1 = vector.shape_cast %0 : vector<1x4x256xf32> to vector<4x256xf32>
    %c0_2 = arith.constant 0 : index
    %c0_3 = arith.constant 0 : index
    %c0_4 = arith.constant 0 : index
    %2 = vector.load %arg4[%c0_2, %c0_3, %c0_4] : memref<1x1x256xi32, #tpu.memory_space<vmem>>, vector<1x1x256xi32>
    %3 = vector.shape_cast %2 : vector<1x1x256xi32> to vector<1x256xi32>
    %cst = arith.constant dense<0xFF800000> : vector<256xf32>
    %4 = vector.multi_reduction <maximumf>, %1, %cst [0] : vector<4x256xf32> to vector<256xf32>
    %5 = vector.shape_cast %4 : vector<256xf32> to vector<1x256xf32>
    %6 = vector.broadcast %5 : vector<1x256xf32> to vector<4x256xf32>
    %7 = arith.subf %1, %6 : vector<4x256xf32>
    %8 = math.exp %7 : vector<4x256xf32>
    %cst_5 = arith.constant dense<0.000000e+00> : vector<256xf32>
    %9 = vector.multi_reduction <add>, %8, %cst_5 [0] : vector<4x256xf32> to vector<256xf32>
    %10 = vector.shape_cast %9 : vector<256xf32> to vector<1x256xf32>
    %11 = tpu.reciprocal %10 {approx = true} : vector<1x256xf32> -> vector<1x256xf32>
    %12 = arith.mulf %10, %11 : vector<1x256xf32>
    %cst_6 = arith.constant 2.000000e+00 : f32
    %13 = vector.broadcast %cst_6 : f32 to vector<1x256xf32>
    %14 = arith.subf %13, %12 : vector<1x256xf32>
    %15 = arith.mulf %11, %14 : vector<1x256xf32>
    %16 = vector.broadcast %15 : vector<1x256xf32> to vector<4x256xf32>
    %17 = arith.mulf %8, %16 : vector<4x256xf32>
    %18 = tpu.iota {dimensions = array<i32: 0>} : vector<4x256xi32>
    %19 = vector.broadcast %3 : vector<1x256xi32> to vector<4x256xi32>
    %20 = arith.cmpi eq, %18, %19 : vector<4x256xi32>
    %21 = math.log %10 : vector<1x256xf32>
    %22 = arith.addf %5, %21 : vector<1x256xf32>
    %cst_7 = arith.constant 0.000000e+00 : f32
    %23 = vector.broadcast %cst_7 : f32 to vector<4x256xf32>
    %24 = arith.select %20, %1, %23 : vector<4x256xi1>, vector<4x256xf32>
    %cst_8 = arith.constant dense<0.000000e+00> : vector<256xf32>
    %25 = vector.multi_reduction <add>, %24, %cst_8 [0] : vector<4x256xf32> to vector<256xf32>
    %26 = vector.shape_cast %25 : vector<256xf32> to vector<1x256xf32>
    %27 = arith.subf %22, %26 : vector<1x256xf32>
    %cst_9 = arith.constant dense<0.000000e+00> : vector<1xf32>
    %28 = vector.multi_reduction <add>, %27, %cst_9 [1] : vector<1x256xf32> to vector<1xf32>
    %29 = vector.shape_cast %28 : vector<1xf32> to vector<1x1xf32>
    %cst_10 = arith.constant 0.000000e+00 : f32
    %30 = vector.broadcast %cst_10 : f32 to vector<4x256xf32>
    %31 = arith.select %20, %17, %30 : vector<4x256xi1>, vector<4x256xf32>
    %cst_11 = arith.constant dense<0.000000e+00> : vector<4xf32>
    %32 = vector.multi_reduction <add>, %31, %cst_11 [1] : vector<4x256xf32> to vector<4xf32>
    %33 = vector.shape_cast %32 : vector<4xf32> to vector<4x1xf32>
    %cst_12 = arith.constant dense<0.000000e+00> : vector<4xf32>
    %34 = vector.multi_reduction <add>, %17, %cst_12 [1] : vector<4x256xf32> to vector<4xf32>
    %35 = vector.shape_cast %34 : vector<4xf32> to vector<4x1xf32>
    %36 = arith.extui %20 : vector<4x256xi1> to vector<4x256xi32>
    %37 = arith.sitofp %36 : vector<4x256xi32> to vector<4x256xf32>
    %cst_13 = arith.constant dense<0.000000e+00> : vector<4xf32>
    %38 = vector.multi_reduction <add>, %37, %cst_13 [1] : vector<4x256xf32> to vector<4xf32>
    %39 = vector.shape_cast %38 : vector<4xf32> to vector<4x1xf32>
    %c0_i32 = arith.constant 0 : i32
    %40 = arith.cmpi eq, %arg2, %c0_i32 : i32
    %41 = arith.extui %40 : i1 to i32
    %c0_i32_14 = arith.constant 0 : i32
    %42 = arith.cmpi ne, %41, %c0_i32_14 : i32
    scf.if %42 {
      %cst_47 = arith.constant 0.000000e+00 : f32
      %59 = vector.broadcast %cst_47 : f32 to vector<1x1x1x1xf32>
      %c0_48 = arith.constant 0 : index
      %c0_49 = arith.constant 0 : index
      %c0_50 = arith.constant 0 : index
      %c0_51 = arith.constant 0 : index
      %60 = vector.load %arg5[%c0_48, %c0_49, %c0_50, %c0_51] : memref<1x1x1x1xf32, #tpu.memory_space<vmem>>, vector<1x1x1x1xf32>
      tpu.vector_store %arg5[%c0_48, %c0_49, %c0_50, %c0_51], %59 {strides = array<i32>} : memref<1x1x1x1xf32, #tpu.memory_space<vmem>>, vector<1x1x1x1xf32>,
      %cst_52 = arith.constant 0.000000e+00 : f32
      %61 = vector.broadcast %cst_52 : f32 to vector<1x1x4x1xf32>
      %c0_53 = arith.constant 0 : index
      %c0_54 = arith.constant 0 : index
      %c0_55 = arith.constant 0 : index
      %c0_56 = arith.constant 0 : index
      %62 = vector.load %arg6[%c0_53, %c0_54, %c0_55, %c0_56] : memref<1x1x4x1xf32, #tpu.memory_space<vmem>>, vector<1x1x4x1xf32>
      tpu.vector_store %arg6[%c0_53, %c0_54, %c0_55, %c0_56], %61 {strides = array<i32>} : memref<1x1x4x1xf32, #tpu.memory_space<vmem>>, vector<1x1x4x1xf32>,
      %cst_57 = arith.constant 0.000000e+00 : f32
      %63 = vector.broadcast %cst_57 : f32 to vector<1x1x4x1xf32>
      %c0_58 = arith.constant 0 : index
      %c0_59 = arith.constant 0 : index
      %c0_60 = arith.constant 0 : index
      %c0_61 = arith.constant 0 : index
      %64 = vector.load %arg7[%c0_58, %c0_59, %c0_60, %c0_61] : memref<1x1x4x1xf32, #tpu.memory_space<vmem>>, vector<1x1x4x1xf32>
      tpu.vector_store %arg7[%c0_58, %c0_59, %c0_60, %c0_61], %63 {strides = array<i32>} : memref<1x1x4x1xf32, #tpu.memory_space<vmem>>, vector<1x1x4x1xf32>,
      %cst_62 = arith.constant 0.000000e+00 : f32
      %65 = vector.broadcast %cst_62 : f32 to vector<1x1x4x1xf32>
      %c0_63 = arith.constant 0 : index
      %c0_64 = arith.constant 0 : index
      %c0_65 = arith.constant 0 : index
      %c0_66 = arith.constant 0 : index
      %66 = vector.load %arg8[%c0_63, %c0_64, %c0_65, %c0_66] : memref<1x1x4x1xf32, #tpu.memory_space<vmem>>, vector<1x1x4x1xf32>
      tpu.vector_store %arg8[%c0_63, %c0_64, %c0_65, %c0_66], %65 {strides = array<i32>} : memref<1x1x4x1xf32, #tpu.memory_space<vmem>>, vector<1x1x4x1xf32>,
    } else {
    }
    %c0_15 = arith.constant 0 : index
    %c0_16 = arith.constant 0 : index
    %c0_17 = arith.constant 0 : index
    %c0_18 = arith.constant 0 : index
    %43 = vector.load %arg5[%c0_15, %c0_16, %c0_17, %c0_18] : memref<1x1x1x1xf32, #tpu.memory_space<vmem>>, vector<1x1x1x1xf32>
    %44 = vector.shape_cast %29 : vector<1x1xf32> to vector<1x1x1x1xf32>
    %45 = arith.addf %43, %44 : vector<1x1x1x1xf32>
    %c0_19 = arith.constant 0 : index
    %c0_20 = arith.constant 0 : index
    %c0_21 = arith.constant 0 : index
    %c0_22 = arith.constant 0 : index
    %46 = vector.load %arg5[%c0_19, %c0_20, %c0_21, %c0_22] : memref<1x1x1x1xf32, #tpu.memory_space<vmem>>, vector<1x1x1x1xf32>
    tpu.vector_store %arg5[%c0_19, %c0_20, %c0_21, %c0_22], %45 {strides = array<i32>} : memref<1x1x1x1xf32, #tpu.memory_space<vmem>>, vector<1x1x1x1xf32>,
    %c0_23 = arith.constant 0 : index
    %c0_24 = arith.constant 0 : index
    %c0_25 = arith.constant 0 : index
    %c0_26 = arith.constant 0 : index
    %47 = vector.load %arg6[%c0_23, %c0_24, %c0_25, %c0_26] : memref<1x1x4x1xf32, #tpu.memory_space<vmem>>, vector<1x1x4x1xf32>
    %48 = vector.shape_cast %33 : vector<4x1xf32> to vector<1x1x4x1xf32>
    %49 = arith.addf %47, %48 : vector<1x1x4x1xf32>
    %c0_27 = arith.constant 0 : index
    %c0_28 = arith.constant 0 : index
    %c0_29 = arith.constant 0 : index
    %c0_30 = arith.constant 0 : index
    %50 = vector.load %arg6[%c0_27, %c0_28, %c0_29, %c0_30] : memref<1x1x4x1xf32, #tpu.memory_space<vmem>>, vector<1x1x4x1xf32>
    tpu.vector_store %arg6[%c0_27, %c0_28, %c0_29, %c0_30], %49 {strides = array<i32>} : memref<1x1x4x1xf32, #tpu.memory_space<vmem>>, vector<1x1x4x1xf32>,
    %c0_31 = arith.constant 0 : index
    %c0_32 = arith.constant 0 : index
    %c0_33 = arith.constant 0 : index
    %c0_34 = arith.constant 0 : index
    %51 = vector.load %arg7[%c0_31, %c0_32, %c0_33, %c0_34] : memref<1x1x4x1xf32, #tpu.memory_space<vmem>>, vector<1x1x4x1xf32>
    %52 = vector.shape_cast %35 : vector<4x1xf32> to vector<1x1x4x1xf32>
    %53 = arith.addf %51, %52 : vector<1x1x4x1xf32>
    %c0_35 = arith.constant 0 : index
    %c0_36 = arith.constant 0 : index
    %c0_37 = arith.constant 0 : index
    %c0_38 = arith.constant 0 : index
    %54 = vector.load %arg7[%c0_35, %c0_36, %c0_37, %c0_38] : memref<1x1x4x1xf32, #tpu.memory_space<vmem>>, vector<1x1x4x1xf32>
    tpu.vector_store %arg7[%c0_35, %c0_36, %c0_37, %c0_38], %53 {strides = array<i32>} : memref<1x1x4x1xf32, #tpu.memory_space<vmem>>, vector<1x1x4x1xf32>,
    %c0_39 = arith.constant 0 : index
    %c0_40 = arith.constant 0 : index
    %c0_41 = arith.constant 0 : index
    %c0_42 = arith.constant 0 : index
    %55 = vector.load %arg8[%c0_39, %c0_40, %c0_41, %c0_42] : memref<1x1x4x1xf32, #tpu.memory_space<vmem>>, vector<1x1x4x1xf32>
    %56 = vector.shape_cast %39 : vector<4x1xf32> to vector<1x1x4x1xf32>
    %57 = arith.addf %55, %56 : vector<1x1x4x1xf32>
    %c0_43 = arith.constant 0 : index
    %c0_44 = arith.constant 0 : index
    %c0_45 = arith.constant 0 : index
    %c0_46 = arith.constant 0 : index
    %58 = vector.load %arg8[%c0_43, %c0_44, %c0_45, %c0_46] : memref<1x1x4x1xf32, #tpu.memory_space<vmem>>, vector<1x1x4x1xf32>
    tpu.vector_store %arg8[%c0_43, %c0_44, %c0_45, %c0_46], %57 {strides = array<i32>} : memref<1x1x4x1xf32, #tpu.memory_space<vmem>>, vector<1x1x4x1xf32>,
    return
  }
  func.func @transform_0(%arg0: i32, %arg1: i32, %arg2: i32) -> (i32, i32, i32) {
    %c1_i32 = arith.constant 1 : i32
    %0 = arith.muli %arg1, %c1_i32 : i32
    %1 = arith.addi %0, %arg2 : i32
    %c0_i32 = arith.constant 0 : i32
    %c0_i32_0 = arith.constant 0 : i32
    return %arg0, %c0_i32, %1 : i32, i32, i32
  }
  func.func @transform_1(%arg0: i32, %arg1: i32, %arg2: i32) -> (i32, i32, i32) {
    %c1_i32 = arith.constant 1 : i32
    %0 = arith.muli %arg1, %c1_i32 : i32
    %1 = arith.addi %0, %arg2 : i32
    %c0_i32 = arith.constant 0 : i32
    %c0_i32_0 = arith.constant 0 : i32
    return %arg0, %c0_i32, %1 : i32, i32, i32
  }
  func.func @transform_2(%arg0: i32, %arg1: i32, %arg2: i32) -> (i32, i32, i32, i32) {
    %c0_i32 = arith.constant 0 : i32
    %c0_i32_0 = arith.constant 0 : i32
    %c0_i32_1 = arith.constant 0 : i32
    return %arg0, %arg1, %c0_i32, %c0_i32_0 : i32, i32, i32, i32
  }
  func.func @transform_3(%arg0: i32, %arg1: i32, %arg2: i32) -> (i32, i32, i32, i32) {
    %c0_i32 = arith.constant 0 : i32
    %c0_i32_0 = arith.constant 0 : i32
    %c0_i32_1 = arith.constant 0 : i32
    return %arg0, %arg1, %c0_i32, %c0_i32_0 : i32, i32, i32, i32
  }
  func.func @transform_4(%arg0: i32, %arg1: i32, %arg2: i32) -> (i32, i32, i32, i32) {
    %c0_i32 = arith.constant 0 : i32
    %c0_i32_0 = arith.constant 0 : i32
    %c0_i32_1 = arith.constant 0 : i32
    return %arg0, %arg1, %c0_i32, %c0_i32_0 : i32, i32, i32, i32
  }
  func.func @transform_5(%arg0: i32, %arg1: i32, %arg2: i32) -> (i32, i32, i32, i32) {
    %c0_i32 = arith.constant 0 : i32
    %c0_i32_0 = arith.constant 0 : i32
    %c0_i32_1 = arith.constant 0 : i32
    return %arg0, %arg1, %c0_i32, %c0_i32_0 : i32, i32, i32, i32
  }
}

</mosaic_0001>

<bundles_post_ra>
// kernel: tpu_custom_call.1
= control target key start
LH: loop header
LB: loop body
LE: loop exit
PB: predicated region body
PF: predicated region fallthrough
CT: control target
= control target key end

     0   :  { %11 = vsyncpa [#allocation3], 0  ;;  %s1241_s0 = inlined_call_operand.hbm [shape: f32[2,4,256], index: 0, kind: input, shape index: {}]   ;;  %s1242_s1 = inlined_call_operand.hbm [shape: s32[2,1,256], index: 1, kind: input, shape index: {}]   ;;  %s1243_s2 = inlined_call_operand.vmem [shape: f32[2,1,1,1], index: 2, kind: output, shape index: {0}]   ;;  %s1244_s3 = inlined_call_operand.vmem [shape: f32[2,1,4,1], index: 3, kind: output, shape index: {1}]   ;;  %s1245_s4 = inlined_call_operand.vmem [shape: f32[2,1,4,1], index: 4, kind: output, shape index: {2}]   ;;  %s1246_s5 = inlined_call_operand.vmem [shape: f32[2,1,4,1], index: 5, kind: output, shape index: {3}]  }
   0x1   :  { %13 = vsyncpa [#allocation3 + $0x1], 0 }
   0x2   :  { %14 = vsyncpa [#allocation5], 0 }
   0x3   :  { %16 = vsyncpa [#allocation5 + $0x1], 0  ;;  %s998_s18 = smov 0   ;;  %s1000_s19 = smov 0  }
   0x4   :  { %s1002_s20 = smov 0   ;;  %s1004_s21 = smov 0  }
   0x5   :  { %s1006_s22 = smov 0   ;;  %s1008_s23 = smov 0  }
   0x6 LB: > { %s755_s24 = sadd.s32 4294967295, %s963_s23   ;;  %s41_s25 = sadd.s32 1, %s959_s22  ;;  %s963_s23 = sphi %s1008_s23, %s22_s23   ;;  %s959_s22 = sphi %s1006_s22, %s1260_s22   ;;  %s955_s21 = sphi %s1004_s21, %s1259_s21   ;;  %s951_s20 = sphi %s1002_s20, %s1258_s20   ;;  %s947_s19 = sphi %s1000_s19, %s1257_s19   ;;  %s943_s18 = sphi %s998_s18, %s1256_s18  }
   0x7   : > { %p43_p0 = scmp.ge.s32.totalorder %s41_s25, 2  ;;  %s52_s26 = sadd.s32 1, %s951_s20 }
   0x8   : > { %p59_p1 = scmp.ne.s32.totalorder %s951_s20, %s947_s19  ;;  %p60_p2 = scmp.eq.s32.totalorder %s963_s23, 0 }
   0x9   : > { %s1262_s25 = smov (%p43_p0, %s41_s25), 0  ;;  %p65_p4 = scmp.ne.s32.totalorder %s947_s19, %s943_s18 }
   0xa   : > { %p1034_p3 = por %p60_p2, %p59_p1  ;;  %s47_s28 = ssub.s32 %s959_s22, %s1262_s25 }
   0xb   : > { %p66_p5 = scmp.eq.s32.totalorder %s755_s24, 0  ;;  %p50_p6 = scmp.eq.s32.totalorder %s47_s28, 0 }
   0xc   : > { %p788_p8 = scmp.lt.s32.totalorder %s963_s23, 2  ;;  %s1050_s6 = sand.u32 1, %s951_s20  }
   0xd   : > { %p1041_p7 = por %p66_p5, %p65_p4  ;;  %s775_s7 = sshll.u32 %s959_s22, 7 }
   0xe   : > { %s1047_s30 = scalar_select %p50_p6, %s951_s20, %s52_s26  }
   0xf   : > { %s1249_s29 = scalar_select %p1041_p7, 1, 0 }
  0x10   : > { %s759_s8 = sshll.u32 %s1050_s6, 3  ;;  %s1057_s11 = scalar_lea.hbm %s1241_s0, %s775_s7 }
  0x11   : > { %s235_s12 = scalar_lea.vmem [#allocation2], %s759_s8  ;;  %p1061_p9 = pnand %p788_p8, %p1034_p3 }
  0x12   : > { %s246_s13 = sshll.u32 %s235_s12, 4  ;;  %s232_s15 = scalar_lea.sflag [#allocation3], %s1050_s6  ;;  %s1065_s13 = int_to_ptr.vmem [resolvable:$true] %s246_s13 }
  0x13   : > { %s849_s16 = scalar_lea.hbm %s1057_s11, 128  ;;  %p851_p13 = pneg %p1061_p9 }
  0x14   : > { %p850_p12 = scmp.ne.s32.totalorder %s1057_s11, %s849_s16  ;;  %s854_s24 = scalar_lea.hbm %s1241_s0, 256 }
  0x15   : > { %p855_p2 = scmp.lt.u32.totalorder %s1057_s11, %s1241_s0  ;;  %p856_p3 = scmp.lt.u32.totalorder %s854_s24, %s849_s16 }
  0x16   : > { %p852_p0 = pnand %p851_p13, %p850_p12  ;;  %p858_p5 = scmp.lt.u32.totalorder %s849_s16, %s1057_s11 }
  0x17   : > { %p857_p4 = por %p856_p3, %p855_p2 }
  0x18   : > { %p853_p1 = pneg %p852_p0 }
  0x19   : > { %p859_p6 = por %p858_p5, %p857_p4 }
  0x1b   : > { %p860_p8 = pnand %p859_p6, %p853_p1 }
  0x1d   : > { %863 = shalt.err (!%p860_p8)
}
  0x1e   : > { %s864_s28 = scalar_lea.vmem %s1065_s13, 128  ;;  %s965_s7 = smov [#allocation2]  }
  0x1f   : > { %p865_p12 = scmp.ne.s32.totalorder %s1065_s13, %s864_s28  ;;  %s869_s8 = sshll.u32 %s965_s7, 4  ;;  %s870_s8 = int_to_ptr.vmem [resolvable:$false] %s869_s8 }
  0x20   : > { %s871_s9 = scalar_lea.vmem %s870_s8, 256  ;;  %p872_p11 = scmp.lt.s32.totalorder %s1065_s13, %s870_s8 }
  0x21   : > { %p867_p0 = pnand %p865_p12, %p851_p13  ;;  %p873_p2 = scmp.lt.s32.totalorder %s871_s9, %s864_s28 }
  0x23   : > { %p868_p10 = pneg %p867_p0  ;;  %p874_p3 = por %p873_p2, %p872_p11 }
  0x25   : > { %p875_p4 = pnand %p874_p3, %p868_p10 }
  0x27   : > { %878 = shalt.err (!%p875_p4)
}
  0x28   : > { %784 = dma.hbm_to_vmem [thread:$0]  (!%p1061_p9), %s1057_s11, 128, %s1065_s13, %s232_s15  }
  0x29   : > { %p1251_p1 = scmp.lt.s32.totalorder %s963_s23, 3  ;;  %p1252_p5 = scmp.ge.s32.totalorder %s963_s23, 1 }
  0x2a   : > { %s762_s12 = sshll.u32 %s1050_s6, 1  ;;  %s776_s16 = sshll.u32 %s959_s22, 5 }
  0x2b   : > { %p1099_p6 = pnand %p1252_p5, %p1251_p1  ;;  %s1108_s24 = scalar_lea.hbm %s1242_s1, %s776_s16 }
  0x2c   : > { %s257_s26 = scalar_lea.vmem [#allocation4], %s762_s12  ;;  %s254_s11 = scalar_lea.sflag [#allocation5], %s1050_s6 }
  0x2d   : > { %s1253_s10 = scalar_select %p1099_p6, 1, 0 }
  0x2e   : > { %s268_s27 = sshll.u32 %s257_s26, 4  ;;  %s879_s13 = scalar_lea.hbm %s1108_s24, 32  ;;  %s269_s27 = int_to_ptr.vmem [resolvable:$true] %s268_s27 }
  0x2f   : > { %p880_p10 = scmp.ne.s32.totalorder %s1108_s24, %s879_s13  ;;  %s884_s7 = scalar_lea.hbm %s1242_s1, 64 }
  0x30   : > { %p885_p12 = scmp.lt.u32.totalorder %s1108_s24, %s1242_s1  ;;  %p886_p0 = scmp.lt.u32.totalorder %s884_s7, %s879_s13 }
  0x31   : > { %p882_p11 = pnand %p880_p10, %p851_p13  ;;  %p888_p3 = scmp.lt.u32.totalorder %s879_s13, %s1108_s24 }
  0x32   : > { %p887_p2 = por %p886_p0, %p885_p12 }
  0x33   : > { %p883_p8 = pneg %p882_p11 }
  0x34   : > { %p889_p4 = por %p888_p3, %p887_p2 }
  0x36   : > { %p890_p1 = pnand %p889_p4, %p883_p8 }
  0x38   : > { %893 = shalt.err (!%p890_p1)
}
  0x39   : > { %s894_s6 = scalar_lea.vmem %s269_s27, 32  ;;  %s966_s12 = smov [#allocation4]  }
  0x3a   : > { %p895_p5 = scmp.ne.s32.totalorder %s269_s27, %s894_s6  ;;  %s899_s16 = sshll.u32 %s966_s12, 4  ;;  %s900_s16 = int_to_ptr.vmem [resolvable:$false] %s899_s16 }
  0x3b   : > { %s901_s17 = scalar_lea.vmem %s900_s16, 64  ;;  %p902_p7 = scmp.lt.s32.totalorder %s269_s27, %s900_s16 }
  0x3c   : > { %p897_p10 = pnand %p895_p5, %p851_p13  ;;  %p903_p6 = scmp.lt.s32.totalorder %s901_s17, %s894_s6 }
  0x3e   : > { %p898_p11 = pneg %p897_p10  ;;  %p904_p0 = por %p903_p6, %p902_p7 }
  0x40   : > { %p905_p12 = pnand %p904_p0, %p898_p11 }
  0x42   : > { %908 = shalt.err (!%p905_p12)
}
  0x43   : > { %787 = dma.hbm_to_vmem [thread:$0]  (!%p1061_p9), %s1108_s24, 32, %s269_s27, %s254_s11  }
  0x44   : > { %p1254_p8 = scmp.ne.s32.totalorder %s1253_s10, 0 }
  0x45   : > { %s279_s18 = sand.u32 (!%p1254_p8), 1, %s947_s19   ;;  %p1255_p13 = scmp.ne.s32.totalorder (!%p1254_p8), %s1249_s29, 0 }
  0x46   : > { %277 = sbr.rel (%p1254_p8) target bundleno = 305 (0x131), region = 28  ;;  %s766_s26 = sshll.u32 (!%p1254_p8), %s279_s18, 3 }
  0x47   : > { %s280_s13 = scalar_lea.sflag (!%p1254_p8), [#allocation3], %s279_s18  ;;  %s283_s15 = scalar_lea.vmem (!%p1254_p8), [#allocation2], %s766_s26 }
  0x4d   : > { %934 = dma.done.wait (%p1255_p13), %s280_s13, 128  }
  0x4e   : > { %936 = vsyncadd (%p1255_p13), %s280_s13, 4294967168  ;;  %s767_s28 = sshll.u32 %s279_s18, 1  ;;  %s289_s7 = scalar_lea.sflag [#allocation5], %s279_s18 }
  0x4f   : > { %s1137_s14 = scalar_lea.vmem [#allocation4], %s767_s28 }
  0x50   : > { %938 = dma.done.wait (%p1255_p13), %s289_s7, 32  }
  0x51   : > { %940 = vsyncadd (%p1255_p13), %s289_s7, 4294967264  ;;  %p350_p7 = scmp.lt.s32.totalorder %s955_s21, 1  ;;  %vm501_vm0 = vcmask 0   ;;  %vm382_vm1 = vcmask 1043456   ;;  %v967_v0 = vmov 0.0   ;;  %v377_v1 = vld [vmem:[%s283_s15] sm:$0xff]  ;;  %v434_v16 = vlaneseq }
  0x52   : > { %v380_v2 = vcombine.high %v377_v1, %v377_v1  ;;  %v383_v3 = vsel %vm382_vm1, %v377_v1, -inf  ;;  %v378_v23 = vld [vmem:[%s1137_s14] sm:$0x3]  ;;  %vm503_vm4 = vcmask 3072  }
  0x53   : > { %s1264_s21 = smov (!%p350_p7, %s955_s21), 1  ;;  %v384_v4 = vrot.slane %v383_v3, 4  ;;  %v1158_v19 = vshrl.u32 %v434_v16, 7 }
  0x54   : > { %s1151_s27 = scalar_lea.vmem %s1243_s2, %s1264_s21  ;;  %v390_v5 = vsel %vm382_vm1, %v380_v2, -inf  ;;  %s768_s29 = sshll.u32 %s1264_s21, 2 }
  0x55   : > { %502 = vst.msk [vmem:[%s1151_s27] sm:$0x1] %vm501_vm0, %v967_v0  ;;  %v385_v6 = vmax.f32 %v383_v3, %v384_v4  ;;  %v391_v7 = vrot.slane %v390_v5, 4  ;;  %v438_v22 = vsub.s32 0, %v1158_v19  ;;  %v442_v24 = vsub.s32 1, %v1158_v19  ;;  %s369_s9 = scalar_lea.vmem %s1245_s4, %s768_s29  ;;  %s376_s16 = scalar_lea.vmem %s1246_s5, %s768_s29 }
  0x56   : > { %505 = vst.msk [vmem:[%s369_s9] sm:$0xf] %vm503_vm4, %v967_v0  ;;  %s362_s26 = scalar_lea.vmem %s1244_s3, %s768_s29  ;;  %506 = vst.msk [vmem:[%s376_s16] sm:$0xf] %vm503_vm4, %v967_v0 }
  0x57   : > { %v386_v8 = vrot.slane %v385_v6, 2  ;;  %v392_v9 = vmax.f32 %v390_v5, %v391_v7  ;;  %v1163_v25 = vrot.slane %v378_v23, %v438_v22  ;;  %v1165_v26 = vrot.slane %v378_v23, %v442_v24  ;;  %504 = vst.msk [vmem:[%s362_s26] sm:$0xf] %vm503_vm4, %v967_v0 }
  0x59   : > { %v387_v10 = vmax.f32 %v385_v6, %v386_v8  ;;  %v393_v11 = vrot.slane %v392_v9, 2  ;;  %vm444_vm2 = vcmp.eq.s32.totalorder %v1158_v19, %v1163_v25  ;;  %vm445_vm3 = vcmp.eq.s32.totalorder %v1158_v19, %v1165_v26 }
  0x5a   : > { %v452_v28 = vsel %vm444_vm2, %v377_v1, 0.0  ;;  %v453_v31 = vsel %vm445_vm3, %v380_v2, 0.0  ;;  %v771_v16 = vsel %vm444_vm2, 1.0, %v967_v0 }
  0x5b   : > { %v388_v12 = vrot.slane %v387_v10, 1  ;;  %v394_v13 = vmax.f32 %v392_v9, %v393_v11  ;;  %v454_v34 = vsel %vm382_vm1, %v452_v28, 0.0  ;;  %v461_v37 = vsel %vm382_vm1, %v453_v31, 0.0 }
  0x5c   : > { %v455_v40 = vrot.slane %v454_v34, 4  ;;  %v462_v41 = vrot.slane %v461_v37, 4  ;;  %v492_v23 = vsel %vm382_vm1, %v771_v16, 0.0  ;;  %v507_v19 = vld [vmem:[%s1151_s27] sm:$0x1] }
  0x5d   : > { %v389_v14 = vmax.f32 %v387_v10, %v388_v12  ;;  %v395_v15 = vrot.slane %v394_v13, 1 }
  0x5e   : > { %v456_v46 = vadd.f32 %v455_v40, %v454_v34  ;;  %v463_v47 = vadd.f32 %v462_v41, %v461_v37  ;;  %v518_v37 = vld [vmem:[%s376_s16] sm:$0xf] }
  0x5f   : > { %v396_v17 = vmax.f32 %v394_v13, %v395_v15 }
  0x60   : > { %v457_v51 = vrot.slane %v456_v46, 2  ;;  %v464_v52 = vrot.slane %v463_v47, 2 }
  0x61   : > { %v399_v18 = vcombine.low %v389_v14, %v396_v17 }
  0x62   : > { %v458_v53 = vadd.f32 %v457_v51, %v456_v46  ;;  %v465_v54 = vadd.f32 %v464_v52, %v463_v47 }
  0x63   : > { %v401_v20 = vsub.f32 %v377_v1, %v399_v18 }
  0x64   : > { %v459_v55 = vrot.slane %v458_v53, 1  ;;  %v466_v56 = vrot.slane %v465_v54, 1 }
  0x65   : > { %v402_v21 = vmul.f32 1.442695, %v401_v20 }
  0x66   : > { %v460_v62 = vadd.f32 %v459_v55, %v458_v53  ;;  %v467_v2 = vadd.f32 %v466_v56, %v465_v54 }
  0x67   : > { %839 = vpow2.f32 %v402_v21 }
  0x71   : > { %v840_v27 = vpop.eup %839 }
  0x72   : > { %v405_v29 = vcombine.high %v840_v27, %v840_v27  ;;  %v407_v30 = vsel %vm382_vm1, %v840_v27, 0.0 }
  0x73   : > { %v408_v32 = vrot.slane %v407_v30, 4 }
  0x74   : > { %v414_v33 = vsel %vm382_vm1, %v405_v29, 0.0 }
  0x75   : > { %v409_v35 = vadd.f32 %v408_v32, %v407_v30  ;;  %v415_v36 = vrot.slane %v414_v33, 4  ;;  %v515_v32 = vld [vmem:[%s369_s9] sm:$0xf] }
  0x77   : > { %v410_v38 = vrot.slane %v409_v35, 2  ;;  %v416_v39 = vadd.f32 %v415_v36, %v414_v33  ;;  %v511_v33 = vld [vmem:[%s362_s26] sm:$0xf] }
  0x79   : > { %v411_v42 = vadd.f32 %v410_v38, %v409_v35  ;;  %v417_v43 = vrot.slane %v416_v39, 2 }
  0x7b   : > { %v412_v44 = vrot.slane %v411_v42, 1  ;;  %v418_v45 = vadd.f32 %v417_v43, %v416_v39 }
  0x7d   : > { %v413_v48 = vadd.f32 %v412_v44, %v411_v42  ;;  %v419_v49 = vrot.slane %v418_v45, 1 }
  0x7f   : > { %v420_v50 = vadd.f32 %v419_v49, %v418_v45  ;;  %841 = vrcp.f32 %v413_v48 }
  0x80   : > { %843 = vlog2.f32 %v413_v48 }
  0x81   : > { %845 = vlog2.f32 %v420_v50 }
  0x82   : > { %847 = vrcp.f32 %v420_v50 }
  0x89   : > { %v842_v57 = vpop.eup %841 }
  0x8a   : > { %v844_v58 = vpop.eup %843  ;;  %v423_v59 = vmul.f32 %v842_v57, %v413_v48 }
  0x8b   : > { %v846_v60 = vpop.eup %845  ;;  %v447_v61 = vmul.f32 0.6931472, %v844_v58 }
  0x8c   : > { %v848_v63 = vpop.eup %847  ;;  %v449_v1 = vmul.f32 0.6931472, %v846_v60  ;;  %v425_v3 = vsub.f32 2.0, %v423_v59 }
  0x8d   : > { %v450_v4 = vadd.f32 %v447_v61, %v389_v14  ;;  %v424_v5 = vmul.f32 %v848_v63, %v420_v50  ;;  %v772_v14 = vsel %vm445_vm3, 1.0, %v967_v0 }
  0x8e   : > { %v451_v6 = vadd.f32 %v449_v1, %v396_v17  ;;  %v427_v9 = vmul.f32 %v842_v57, %v425_v3  ;;  %v493_v24 = vsel %vm382_vm1, %v772_v14, 0.0 }
  0x8f   : > { %v468_v7 = vsub.f32 %v450_v4, %v460_v62  ;;  %v426_v8 = vsub.f32 2.0, %v424_v5  ;;  %v494_v25 = vadd.f32 %v493_v24, %v492_v23 }
  0x90   : > { %v469_v10 = vsub.f32 %v451_v6, %v467_v2 }
  0x91   : > { %v428_v11 = vmul.f32 %v848_v63, %v426_v8 }
  0x92   : > { %v470_v12 = vadd.f32 %v469_v10, %v468_v7 }
  0x93   : > { %v431_v13 = vcombine.low %v427_v9, %v428_v11 }
  0x94   : > { %471 = vadd.xlane.f32.xlu0 %v470_v12 }
  0x95   : > { %v433_v15 = vmul.f32 %v840_v27, %v431_v13 }
  0x97   : > { %v474_v17 = vcombine.high %v433_v15, %v433_v15  ;;  %v483_v18 = vsel %vm382_vm1, %v433_v15, 0.0  ;;  %v476_v20 = vsel %vm444_vm2, %v433_v15, 0.0 }
  0x98   : > { %v478_v21 = vsel %vm382_vm1, %v476_v20, 0.0 }
  0x99   : > { %v484_v22 = vsel %vm382_vm1, %v474_v17, 0.0  ;;  %v477_v27 = vsel %vm445_vm3, %v474_v17, 0.0 }
  0x9a   : > { %v485_v28 = vadd.f32 %v484_v22, %v483_v18  ;;  %v479_v29 = vsel %vm382_vm1, %v477_v27, 0.0 }
  0x9b   : > { %v480_v30 = vadd.f32 %v479_v29, %v478_v21 }
  0x9c   : > { %486 = vadd.xlane.f32.xlu1 %v485_v28 }
  0x9d   : > { %481 = vadd.xlane.f32.xlu0 %v480_v30 }
  0xa0   : > { %495 = vadd.xlane.f32.xlu1 %v494_v25 }
 0x121   : > { %v472_v26 = vpop.xlane.xlu0 %471 }
 0x122   : > { %v508_v31 = vadd.f32 %v507_v19, %v472_v26 }
 0x124   : > { %510 = vst.msk [vmem:[%s1151_s27] sm:$0x1] %vm501_vm0, %v508_v31 }
 0x129   : > { %v487_v34 = vpop.xlane.xlu1 %486 }
 0x12a   : > { %v516_v35 = vadd.f32 %v515_v32, %v487_v34  ;;  %v482_v36 = vpop.xlane.xlu0 %481 }
 0x12b   : > { %v512_v38 = vadd.f32 %v511_v33, %v482_v36 }
 0x12c   : > { %517 = vst.msk [vmem:[%s369_s9] sm:$0xf] %vm503_vm4, %v516_v35 }
 0x12d   : > { %v496_v39 = vpop.xlane.xlu1 %495  ;;  %514 = vst.msk [vmem:[%s362_s26] sm:$0xf] %vm503_vm4, %v512_v38 }
 0x12e   : > { %v519_v40 = vadd.f32 %v518_v37, %v496_v39 }
 0x130   : > { %520 = vst.msk [vmem:[%s376_s16] sm:$0xf] %vm503_vm4, %v519_v40 }
 0x131 PF: > { %s22_s23 = sadd.s32 1, %s963_s23   ;;  %s1256_s18 = smov %s947_s19 }
 0x132   : > { %p19_p9 = scmp.ge.s32.totalorder %s22_s23, 4   ;;  %s1257_s19 = smov %s951_s20 }
 0x133   : > { %s1258_s20 = smov %s1047_s30  ;;  %s1259_s21 = smov %s959_s22 }
 0x134   : > { %s1260_s22 = smov %s1262_s25  ;;  %21 = sbr.rel (!%p19_p9) target bundleno = 6 (0x6), region = 121 }
 0x13b   :  { %604 = vsyncpa [#allocation3], 1 }
 0x13c   :  { %606 = vsyncpa [#allocation3 + $0x1], 1 }
 0x13d   :  { %607 = vsyncpa [#allocation5], 1 }
 0x13e   :  { %609 = vsyncpa [#allocation5 + $0x1], 1 }

</bundles_post_ra>
